<compile_context>
chip_gen: v6e
topology: v6e:2x2x1
jax: 0.10.0
libtpu: 0.0.40
codegen_flags: <defaults>
</compile_context>

<pallas_src>
import numpy as np
import jax
import jax.numpy as jnp
from jax.experimental import pallas as pl
from jax.experimental.pallas import tpu as pltpu


def _round_up(x: int, m: int) -> int:
    return ((x + m - 1) // m) * m


def tokenizer_kernel(idx_ref, x2d_ref, wbd_ref, embx_ref, bias_ref, out_ref):
    """One grid step processes a batch tile of Bt rows.

    idx_ref  : (Bt, C)        int32  categorical ids (LOCAL, per column)
    x2d_ref  : (Bt, N*d)      f32    flattened numeric features
    wbd_ref  : (N*d, N*T)     f32    block-diagonal numeric projection weight
    embx_ref : (C, Kp, T)     f32    per-category embedding table, zero-padded to Kp rows
    bias_ref : (1, (C+N)*T)   f32    flattened bias row (cat tokens first, then numeric)
    out_ref  : (Bt, (C+N)*T)  f32    all tokens for this tile (lane-dense slab)
    """
    Bt, C = idx_ref.shape
    Kp = embx_ref.shape[1]

    # ---- numeric tokens: single MXU matmul against the block-diagonal weight ----
    num = jnp.dot(x2d_ref[...], wbd_ref[...],
                  preferred_element_type=jnp.float32)            # (Bt, N*T)

    # ---- categorical tokens: per-category one-hot (Kp lanes) @ (Kp, T) table ----
    iota_k = jax.lax.broadcasted_iota(jnp.int32, (Bt, Kp), 1)    # (Bt, Kp)
    pieces = []
    for j in range(C):                                           # C is small & static
        ids_j = idx_ref[:, pl.ds(j, 1)]                          # (Bt, 1) local ids
        onehot = (iota_k == ids_j).astype(jnp.float32)           # (Bt, Kp)
        tok = jnp.dot(onehot, embx_ref[j],
                      preferred_element_type=jnp.float32)        # (Bt, T)
        pieces.append(tok)

    # ---- assemble one lane-dense slab, fused bias add, single full-block store ----
    slab = jnp.concatenate(pieces + [num], axis=-1)              # (Bt, (C+N)*T)
    out_ref[...] = (slab + bias_ref[...]).astype(out_ref.dtype)


def tokenizer_forward(x_num, x_cat, weight, emb, categories, bias, *, b_tile=1024):
    """Forward pass of Tokenizer.

    x_num      : (B, N, d)   float
    x_cat      : (B, C)      int    per-column (local) category ids
    weight     : (N, d, T)   float
    emb        : (V, T)      float  V = sum(categories)
    categories : static Python sequence of per-column cardinalities (len C)
    bias       : (C + N, T)  float
    returns    : (B, C + N, T) float32
    """
    B, N, d = x_num.shape
    C = len(categories)
    V, T = emb.shape
    n_tot = C + N
    offs = np.concatenate([[0], np.cumsum(categories)[:-1]]).astype(np.int64)

    # Batch tile: multiple of 8 (sublane), capped by the (rounded-up) batch size.
    bt = max(8, min(int(b_tile), _round_up(B, 8)))
    bt = _round_up(bt, 8)
    b_pad = _round_up(B, bt)
    n_tiles = b_pad // bt

    # ---- wrapper-side prep (cheap, one-time XLA ops) ----
    x2d = x_num.reshape(B, N * d).astype(jnp.float32)
    idx = x_cat.astype(jnp.int32)
    if b_pad != B:
        x2d = jnp.pad(x2d, ((0, b_pad - B), (0, 0)))
        idx = jnp.pad(idx, ((0, b_pad - B), (0, 0)))    # id 0 is always valid; rows discarded

    # Block-diagonal projection weight: row block i, col block i = weight[i] (d, T).
    eye = jnp.eye(N, dtype=jnp.float32)
    w_bd = (eye[:, None, :, None] * weight.astype(jnp.float32)[:, :, None, :]
            ).reshape(N * d, N * T)

    # Per-category, zero-padded embedding table indexed by LOCAL ids.
    Kp = _round_up(max(int(c) for c in categories), 8)
    emb_f = emb.astype(jnp.float32)
    embx = jnp.zeros((C, Kp, T), jnp.float32)
    for j, card in enumerate(categories):
        card = int(card)
        embx = embx.at[j, :card].set(emb_f[int(offs[j]):int(offs[j]) + card])

    bias_row = bias.astype(jnp.float32).reshape(1, n_tot * T)

    grid_spec = pltpu.PrefetchScalarGridSpec(
        num_scalar_prefetch=0,
        grid=(n_tiles,),
        in_specs=[
            pl.BlockSpec((bt, C), lambda b: (b, 0)),            # local cat ids (per tile)
            pl.BlockSpec((bt, N * d), lambda b: (b, 0)),        # numeric, flattened (per tile)
            pl.BlockSpec((N * d, N * T), lambda b: (0, 0)),     # block-diag weight (shared)
            pl.BlockSpec((C, Kp, T), lambda b: (0, 0, 0)),      # padded embedding table (shared)
            pl.BlockSpec((1, n_tot * T), lambda b: (0, 0)),     # flattened bias (shared)
        ],
        out_specs=pl.BlockSpec((bt, n_tot * T), lambda b: (b, 0)),
    )

    out = pl.pallas_call(
        tokenizer_kernel,
        out_shape=jax.ShapeDtypeStruct((b_pad, n_tot * T), jnp.float32),
        grid_spec=grid_spec,
        compiler_params=pltpu.CompilerParams(
            dimension_semantics=("parallel",),
            vmem_limit_bytes=32 * 1024 * 1024,
        ),
    )(idx, x2d, w_bd, embx, bias_row)

    # Cheap layout plumbing back to the PyTorch output layout (B, C + N, T).
    return out[:B].reshape(B, n_tot, T)


if __name__ == "__main__":
    # Small shapes consistent with the module.
    B = 2
    d_numerical = 4
    d = 8
    d_token = 16
    categories = [3, 5, 7]
    n_cat = len(categories)
    vocab = int(sum(categories))
    n_tokens = n_cat + d_numerical          # d_bias = d_numerical + len(categories)

    key = jax.random.PRNGKey(0)
    k_w, k_b, k_e, k_xn, k_xc = jax.random.split(key, 5)

    # Deterministic kaiming_uniform_(a=sqrt(5)) equivalent: U(-1/sqrt(fan_in), 1/sqrt(fan_in))
    bw = 1.0 / np.sqrt(d * d_token)
    weight = jax.random.uniform(k_w, (d_numerical, d, d_token), jnp.float32, -bw, bw)
    bb = 1.0 / np.sqrt(d_token)
    bias = jax.random.uniform(k_b, (n_tokens, d_token), jnp.float32, -bb, bb)
    emb = jax.random.uniform(k_e, (vocab, d_token), jnp.float32, -bb, bb)
    offsets = jnp.asarray(np.concatenate([[0], np.cumsum(categories)[:-1]]), dtype=jnp.int32)

    x_num = jax.random.normal(k_xn, (B, d_numerical, d), jnp.float32)
    x_cat = jnp.stack(
        [jax.random.randint(jax.random.fold_in(k_xc, j), (B,), 0, categories[j])
         for j in range(n_cat)], axis=1).astype(jnp.int32)

    out = tokenizer_forward(x_num, x_cat, weight, emb, categories, bias)
    out = jax.block_until_ready(out)

    # Pure-JAX reference (mirrors the PyTorch forward exactly).
    ref_num = jnp.einsum("bik,ikt->bit", x_num, weight)
    ref_cat = emb[x_cat + offsets[None, :]]
    ref = jnp.concatenate([ref_cat, ref_num], axis=1) + bias[None]
    np.testing.assert_allclose(np.asarray(out), np.asarray(ref), rtol=1e-5, atol=1e-5)

    print("KERNEL_OK")
</pallas_src>

<mosaic_0001>
module attributes {stable_mosaic.version = 11 : i64} {
  func.func @tokenizer_kernel(%arg0: i32, %arg1: memref<8x3xi32, #tpu.memory_space<vmem>>, %arg2: memref<8x32xf32, #tpu.memory_space<vmem>>, %arg3: memref<32x64xf32, #tpu.memory_space<vmem>>, %arg4: memref<3x8x16xf32, #tpu.memory_space<vmem>>, %arg5: memref<1x112xf32, #tpu.memory_space<vmem>>, %arg6: memref<8x112xf32, #tpu.memory_space<vmem>>) attributes {dimension_semantics = [#tpu.dimension_semantics<parallel>], iteration_bounds = array<i64: 1>, scalar_prefetch = 0 : i64, scratch_operands = 0 : i64, tpu.core_type = #tpu.core_type<tc>, window_params = [{transform_indices = @transform_0, window_bounds = array<i64: 8, 3>}, {transform_indices = @transform_1, window_bounds = array<i64: 8, 32>}, {pipeline_mode = #tpu.pipeline_mode<synchronous>, transform_indices = @transform_2, window_bounds = array<i64: 32, 64>}, {pipeline_mode = #tpu.pipeline_mode<synchronous>, transform_indices = @transform_3, window_bounds = array<i64: 3, 8, 16>}, {pipeline_mode = #tpu.pipeline_mode<synchronous>, transform_indices = @transform_4, window_bounds = array<i64: 1, 112>}, {transform_indices = @transform_5, window_bounds = array<i64: 8, 112>}]} {
    %c0 = arith.constant 0 : index
    %c0_0 = arith.constant 0 : index
    %0 = vector.load %arg2[%c0, %c0_0] : memref<8x32xf32, #tpu.memory_space<vmem>>, vector<8x32xf32>
    %c0_1 = arith.constant 0 : index
    %c0_2 = arith.constant 0 : index
    %1 = vector.load %arg3[%c0_1, %c0_2] : memref<32x64xf32, #tpu.memory_space<vmem>>, vector<32x64xf32>
    %cst = arith.constant dense<0.000000e+00> : vector<8x64xf32>
    %2 = tpu.matmul %0, %1, %cst {dimension_numbers = #tpu.dot_dimension_numbers<[1], [0], [0], [1], [0, 0, 1, 1], [], []>} : vector<8x32xf32>, vector<32x64xf32>, vector<8x64xf32> -> vector<8x64xf32>
    %3 = tpu.iota {dimensions = array<i32: 1>} : vector<8x8xi32>
    %c0_3 = arith.constant 0 : index
    %c0_4 = arith.constant 0 : index
    %4 = vector.load %arg1[%c0_3, %c0_4] : memref<8x3xi32, #tpu.memory_space<vmem>>, vector<8x1xi32>
    %5 = vector.broadcast %4 : vector<8x1xi32> to vector<8x8xi32>
    %6 = arith.cmpi eq, %3, %5 : vector<8x8xi32>
    %7 = arith.extui %6 : vector<8x8xi1> to vector<8x8xi32>
    %8 = arith.sitofp %7 : vector<8x8xi32> to vector<8x8xf32>
    %c0_5 = arith.constant 0 : index
    %c0_6 = arith.constant 0 : index
    %c0_7 = arith.constant 0 : index
    %9 = vector.load %arg4[%c0_5, %c0_6, %c0_7] : memref<3x8x16xf32, #tpu.memory_space<vmem>>, vector<1x8x16xf32>
    %10 = vector.shape_cast %9 : vector<1x8x16xf32> to vector<8x16xf32>
    %cst_8 = arith.constant dense<0.000000e+00> : vector<8x16xf32>
    %11 = tpu.matmul %8, %10, %cst_8 {dimension_numbers = #tpu.dot_dimension_numbers<[1], [0], [0], [1], [0, 0, 1, 1], [], []>} : vector<8x8xf32>, vector<8x16xf32>, vector<8x16xf32> -> vector<8x16xf32>
    %c0_9 = arith.constant 0 : index
    %c1 = arith.constant 1 : index
    %12 = vector.load %arg1[%c0_9, %c1] : memref<8x3xi32, #tpu.memory_space<vmem>>, vector<8x1xi32>
    %13 = vector.broadcast %12 : vector<8x1xi32> to vector<8x8xi32>
    %14 = arith.cmpi eq, %3, %13 : vector<8x8xi32>
    %15 = arith.extui %14 : vector<8x8xi1> to vector<8x8xi32>
    %16 = arith.sitofp %15 : vector<8x8xi32> to vector<8x8xf32>
    %c1_10 = arith.constant 1 : index
    %c0_11 = arith.constant 0 : index
    %c0_12 = arith.constant 0 : index
    %17 = vector.load %arg4[%c1_10, %c0_11, %c0_12] : memref<3x8x16xf32, #tpu.memory_space<vmem>>, vector<1x8x16xf32>
    %18 = vector.shape_cast %17 : vector<1x8x16xf32> to vector<8x16xf32>
    %cst_13 = arith.constant dense<0.000000e+00> : vector<8x16xf32>
    %19 = tpu.matmul %16, %18, %cst_13 {dimension_numbers = #tpu.dot_dimension_numbers<[1], [0], [0], [1], [0, 0, 1, 1], [], []>} : vector<8x8xf32>, vector<8x16xf32>, vector<8x16xf32> -> vector<8x16xf32>
    %c0_14 = arith.constant 0 : index
    %c2 = arith.constant 2 : index
    %20 = vector.load %arg1[%c0_14, %c2] : memref<8x3xi32, #tpu.memory_space<vmem>>, vector<8x1xi32>
    %21 = vector.broadcast %20 : vector<8x1xi32> to vector<8x8xi32>
    %22 = arith.cmpi eq, %3, %21 : vector<8x8xi32>
    %23 = arith.extui %22 : vector<8x8xi1> to vector<8x8xi32>
    %24 = arith.sitofp %23 : vector<8x8xi32> to vector<8x8xf32>
    %c2_15 = arith.constant 2 : index
    %c0_16 = arith.constant 0 : index
    %c0_17 = arith.constant 0 : index
    %25 = vector.load %arg4[%c2_15, %c0_16, %c0_17] : memref<3x8x16xf32, #tpu.memory_space<vmem>>, vector<1x8x16xf32>
    %26 = vector.shape_cast %25 : vector<1x8x16xf32> to vector<8x16xf32>
    %cst_18 = arith.constant dense<0.000000e+00> : vector<8x16xf32>
    %27 = tpu.matmul %24, %26, %cst_18 {dimension_numbers = #tpu.dot_dimension_numbers<[1], [0], [0], [1], [0, 0, 1, 1], [], []>} : vector<8x8xf32>, vector<8x16xf32>, vector<8x16xf32> -> vector<8x16xf32>
    %28 = tpu.concatenate %11, %19, %27, %2 in 1 : vector<8x16xf32>, vector<8x16xf32>, vector<8x16xf32>, vector<8x64xf32> -> vector<8x112xf32>
    %c0_19 = arith.constant 0 : index
    %c0_20 = arith.constant 0 : index
    %29 = vector.load %arg5[%c0_19, %c0_20] : memref<1x112xf32, #tpu.memory_space<vmem>>, vector<1x112xf32>
    %30 = vector.broadcast %29 : vector<1x112xf32> to vector<8x112xf32>
    %31 = arith.addf %28, %30 : vector<8x112xf32>
    %c0_21 = arith.constant 0 : index
    %c0_22 = arith.constant 0 : index
    %32 = vector.load %arg6[%c0_21, %c0_22] : memref<8x112xf32, #tpu.memory_space<vmem>>, vector<8x112xf32>
    tpu.vector_store %arg6[%c0_21, %c0_22], %31 {strides = array<i32>} : memref<8x112xf32, #tpu.memory_space<vmem>>, vector<8x112xf32>,
    return
  }
  func.func @transform_0(%arg0: i32) -> (i32, i32) {
    %c0_i32 = arith.constant 0 : i32
    %c0_i32_0 = arith.constant 0 : i32
    return %arg0, %c0_i32 : i32, i32
  }
  func.func @transform_1(%arg0: i32) -> (i32, i32) {
    %c0_i32 = arith.constant 0 : i32
    %c0_i32_0 = arith.constant 0 : i32
    return %arg0, %c0_i32 : i32, i32
  }
  func.func @transform_2(%arg0: i32) -> (i32, i32) {
    %c0_i32 = arith.constant 0 : i32
    %c0_i32_0 = arith.constant 0 : i32
    %c0_i32_1 = arith.constant 0 : i32
    return %c0_i32, %c0_i32_0 : i32, i32
  }
  func.func @transform_3(%arg0: i32) -> (i32, i32, i32) {
    %c0_i32 = arith.constant 0 : i32
    %c0_i32_0 = arith.constant 0 : i32
    %c0_i32_1 = arith.constant 0 : i32
    %c0_i32_2 = arith.constant 0 : i32
    return %c0_i32, %c0_i32_0, %c0_i32_1 : i32, i32, i32
  }
  func.func @transform_4(%arg0: i32) -> (i32, i32) {
    %c0_i32 = arith.constant 0 : i32
    %c0_i32_0 = arith.constant 0 : i32
    %c0_i32_1 = arith.constant 0 : i32
    return %c0_i32, %c0_i32_0 : i32, i32
  }
  func.func @transform_5(%arg0: i32) -> (i32, i32) {
    %c0_i32 = arith.constant 0 : i32
    %c0_i32_0 = arith.constant 0 : i32
    return %arg0, %c0_i32 : i32, i32
  }
}

</mosaic_0001>

<bundles_post_ra>
// kernel: tpu_custom_call.1
= control target key start
LH: loop header
LB: loop body
LE: loop exit
PB: predicated region body
PF: predicated region fallthrough
CT: control target
= control target key end

     0   :  { %10 = vsyncpa [#allocation3], 0  ;;  %s615_s0 = inlined_call_operand.vmem [shape: s32[8,3], index: 0, kind: input, shape index: {}]   ;;  %s616_s1 = inlined_call_operand.vmem [shape: f32[8,32], index: 1, kind: input, shape index: {}]   ;;  %s617_s2 = inlined_call_operand.hbm [shape: f32[32,64], index: 2, kind: input, shape index: {}]   ;;  %s618_s3 = inlined_call_operand.hbm [shape: f32[3,8,16], index: 3, kind: input, shape index: {}]   ;;  %s619_s4 = inlined_call_operand.vmem [shape: f32[1,112], index: 4, kind: input, shape index: {}]   ;;  %s620_s5 = inlined_call_operand.hbm [shape: f32[8,112], index: 5, kind: output, shape index: {}]  }
   0x1   :  { %11 = vsyncpa [#allocation6], 0 }
   0x2   :  { %12 = vsyncpa [#allocation4], 0  ;;  %s545_s18 = smov [#allocation2]  }
   0x3   :  { %s22_s19 = sshll.u32 %s545_s18, 4  ;;  %s23_s19 = int_to_ptr.vmem [resolvable:$true] %s22_s19 }
   0x4   :  { %s487_s20 = scalar_lea.vmem %s23_s19, 512  ;;  %p492_p1 = scmp.lt.s32.totalorder %s23_s19, %s23_s19 }
   0x5   :  { %p488_p0 = scmp.ne.s32.totalorder %s23_s19, %s487_s20  ;;  %p493_p2 = scmp.lt.s32.totalorder %s487_s20, %s487_s20 }
   0x7   :  { %p494_p3 = por %p493_p2, %p492_p1 }
   0x9   :  { %p495_p4 = pnand %p494_p3, %p488_p0 }
   0xb   :  { %498 = shalt.err (!%p495_p4)
}
   0xc   :  { %s546_s21 = smov 128   ;;  %s547_s22 = smov 8  }
   0xd   :  { %28 = dma.hbm_to_vmem [thread:$0]  %s617_s2, 512, %s23_s19, [#allocation3], %s546_s21, %s546_s21, %s547_s22  }
   0xe   :  { %s548_s25 = smov [#allocation5]  }
   0xf   :  { %s34_s26 = sshll.u32 %s548_s25, 4  ;;  %s35_s26 = int_to_ptr.vmem [resolvable:$true] %s34_s26 }
  0x10   :  { %s507_s27 = scalar_lea.vmem %s35_s26, 384  ;;  %p512_p6 = scmp.lt.s32.totalorder %s35_s26, %s35_s26 }
  0x11   :  { %p508_p5 = scmp.ne.s32.totalorder %s35_s26, %s507_s27  ;;  %p513_p7 = scmp.lt.s32.totalorder %s507_s27, %s507_s27 }
  0x13   :  { %p514_p8 = por %p513_p7, %p512_p6 }
  0x15   :  { %p515_p9 = pnand %p514_p8, %p508_p5 }
  0x17   :  { %518 = shalt.err (!%p515_p9)
}
  0x18   :  { %40 = dma.hbm_to_vmem [thread:$0]  %s618_s3, 384, %s35_s26, [#allocation6], %s546_s21, %s546_s21, %s547_s22  }
  0x19   :  { %539 = dma.done.wait [#allocation3], 512  }
  0x1a   :  { %540 = vsyncadd [#allocation3], 4294966784 }
  0x1b   :  { %541 = dma.done.wait [#allocation6], 384  }
  0x1c   :  { %542 = vsyncadd [#allocation6], 4294966912  ;;  %v549_v0 = vmov 0   ;;  %v550_v1 = vmov 2   ;;  %v551_v2 = vmov 0.0   ;;  %vm552_vm0 = vmmov 0  }
  0x1d   :  { %475 = vset.pattern.permute.xlu0 %v549_v0  ;;  %477 = vset.pattern.permute.xlu1 %v550_v1  ;;  %v130_v3 = vld [vmem:[%s615_s0] sm:$0xff]  ;;  %v53_v5 = vld [vmem:[#allocation2 + $0x18] sm:$0xff]  ;;  %v52_v6 = vld [vmem:[#allocation2 + $0x10] sm:$0xff]  ;;  %v553_v8 = vmov 1   ;;  %vm54_vm1 = vcmask 261120   ;;  %v128_v11 = vlaneseq  ;;  %vm138_vm2 = vcmask 64512  }
  0x1e   :  { %447 = vmatprep.subr.mxu1 %v551_v2  ;;  %436 = vmatprep.subr.mxu0 %v551_v2  ;;  %v137_v4 = vld [vmem:[#allocation5] sm:$0xff]  ;;  %v51_v7 = vld [vmem:[#allocation2 + $0x8] sm:$0xff]  ;;  %v300_v18 = vld [vmem:[#allocation5 + $0x10] sm:$0xff]  ;;  %s554_s0 = smov 48   ;;  %s556_s7 = smov 32   ;;  %vm386_vm6 = vcmask 130048  }
  0x1f   :  { %449 = vmatprep.mubr.msk.f32.mxu1 %vm552_vm0, %v551_v2  ;;  %444 = vmatprep.mubr.msk.f32.mxu0 %vm552_vm0, %v551_v2  ;;  %v50_v9 = vld [vmem:[#allocation2] sm:$0xff]  ;;  %v129_v12 = vand.u32 127, %v128_v11  ;;  %v219_v14 = vld [vmem:[#allocation5 + $0x8] sm:$0xff]  ;;  %vm389_vm7 = vcmask 392192   ;;  %s557_s10 = smov [#allocation7]   ;;  %vm399_vm8 = vcmask 916480  }
  0x20   :  { %132 = vperm.xlu0 %475, %v130_v3   ;;  %294 = vperm.xlu1 %477, %v130_v3   ;;  %v49_v10 = vld [vmem:[%s616_s1] sm:$0xff]  ;;  %s555_s1 = smov 16   ;;  %s407_s11 = sshll.u32 %s557_s10, 4  ;;  %s408_s11 = int_to_ptr.vmem [resolvable:$true] %s407_s11 }
  0x21   :  { %448 = vmatpush3.msra.mxu1 %v137_v4  ;;  %437 = vmatpush3.msra.mxu0 %v53_v5  ;;  %v424_v33 = vld [vmem:[%s619_s4] ss:$0 sm:$0xff]  ;;  %s519_s12 = scalar_lea.vmem %s408_s11, 128  ;;  %p524_p11 = scmp.lt.s32.totalorder %s408_s11, %s408_s11 }
  0x22   :  { %452 = vmatprep.subr.mxu1 %v551_v2  ;;  %438 = vmatprep.subr.mxu0 %v551_v2  ;;  %p520_p10 = scmp.ne.s32.totalorder %s408_s11, %s519_s12  ;;  %p525_p12 = scmp.lt.s32.totalorder %s519_s12, %s519_s12 }
  0x23   :  { %439 = vmatpush3.msra.mxu0 %v52_v6 }
  0x24   :  { %476 = vset.pattern.permute.xlu0 %v553_v8  ;;  %440 = vmatprep.subr.mxu0 %v551_v2  ;;  %p526_p13 = por %p525_p12, %p524_p11 }
  0x25   :  { %213 = vperm.xlu0 %476, %v130_v3   ;;  %441 = vmatpush3.msra.mxu0 %v51_v7 }
  0x26   :  { %442 = vmatprep.subr.mxu0 %v551_v2  ;;  %p527_p0 = pnand %p526_p13, %p520_p10 }
  0x27   :  { %443 = vmatpush3.msra.mxu0 %v50_v9 }
  0x28   :  { %445 = vmatmul.mubr.msk.f32.vlgmr.msra.gmra.mxu0 %vm54_vm1, %v49_v10 }
  0x29   :  { %478 = vset.pattern.permute.xlu0 %v550_v1 }
  0x9b   :  { %v133_v13 = vpop.permute.xlu0 %132  ;;  %v295_v16 = vpop.permute.xlu1 %294 }
  0x9c   :  { %vm134_vm3 = vcmp.eq.s32.totalorder %v129_v12, %v133_v13  ;;  %vm296_vm5 = vcmp.eq.s32.totalorder %v129_v12, %v295_v16 }
  0x9d   :  { %v418_v15 = vsel %vm134_vm3, 1.0, %v551_v2  ;;  %v422_v20 = vsel %vm296_vm5, 1.0, %v551_v2 }
  0x9e   :  { %450 = vmatmul.mubr.msk.f32.vlgmr.msra.gmra.mxu1 %vm138_vm2, %v418_v15 }
  0x9f   :  { %453 = vmatpush3.msra.mxu1 %v219_v14  ;;  %454 = vmatprep.mubr.msk.f32.mxu1 %vm552_vm0, %v551_v2 }
  0xa0   :  { %v214_v17 = vpop.permute.xlu0 %213  ;;  %457 = vmatprep.subr.mxu1 %v551_v2 }
  0xa1   :  { %vm215_vm4 = vcmp.eq.s32.totalorder %v129_v12, %v214_v17 }
  0xa2   :  { %v420_v19 = vsel %vm215_vm4, 1.0, %v551_v2 }
  0xa3   :  { %455 = vmatmul.mubr.msk.f32.vlgmr.msra.gmra.mxu1 %vm138_vm2, %v420_v19 }
  0xa4   :  { %458 = vmatpush3.msra.mxu1 %v300_v18  ;;  %459 = vmatprep.mubr.msk.f32.mxu1 %vm552_vm0, %v551_v2 }
  0xa7   :  { %460 = vmatmul.mubr.msk.f32.vlgmr.msra.gmra.mxu1 %vm138_vm2, %v422_v20 }
  0xe8   :  { %v124_v21 = vpop.f32.mrf.mxu0 }
  0xe9   :  { %383 = vrot.lane.b32.xlu0 %v124_v21, %s554_s0 }
  0xea   :  { %v446_v22 = vpop.f32.mrf.mxu0 }
 0x15b   :  { %v384_v30 = vpop.permute.xlu0 %383 }
 0x15e   :  { %v208_v23 = vpop.f32.mrf.mxu1 }
 0x160   :  { %v451_v24 = vpop.f32.mrf.mxu1 }
 0x163   :  { %v289_v25 = vpop.f32.mrf.mxu1 }
 0x164   :  { %375 = vrot.lane.b32.xlu1 %v289_v25, %s555_s1 }
 0x165   :  { %v456_v26 = vpop.f32.mrf.mxu1 }
 0x167   :  { %v370_v27 = vpop.f32.mrf.mxu1 }
 0x168   :  { %379 = vrot.lane.b32.xlu1 %v370_v27, %s556_s7 }
 0x169   :  { %v461_v28 = vpop.f32.mrf.mxu1 }
 0x1d6   :  { %v376_v29 = vpop.permute.xlu1 %375 }
 0x1d7   :  { %v387_v31 = vsel %vm386_vm6, %v208_v23, %v376_v29 }
 0x1da   :  { %v380_v32 = vpop.permute.xlu1 %379 }
 0x1db   :  { %v388_v34 = vsel %vm54_vm1, %v387_v31, %v380_v32 }
 0x1dc   :  { %v390_v35 = vsel %vm389_vm7, %v388_v34, %v384_v30 }
 0x1dd   :  { %v398_v36 = vadd.f32 %v424_v33, %v390_v35 }
 0x1df   :  { %400 = vst.msk [vmem:[#allocation7] sm:$0xff] %vm399_vm8, %v398_v36 }
 0x1e0   :  { %530 = shalt.err (!%p527_p0)
}
 0x1e1   :  { %410 = dma.vmem_to_hbm [thread:$0]  %s408_s11, 128, %s620_s5, [#allocation4]  }
 0x1e2   :  { %543 = dma.done.wait [#allocation4], 128  }
 0x1e3   :  { %544 = vsyncadd [#allocation4], 4294967168 }
 0x1e4   :  { %414 = vsyncpa [#allocation3], 1 }
 0x1e5   :  { %415 = vsyncpa [#allocation6], 1 }
 0x1e6   :  { %416 = vsyncpa [#allocation4], 1 }

</bundles_post_ra>
